<compile_context>
chip_gen: v7x
topology: tpu7x:2x2x1
jax: 0.10.0
libtpu: 0.0.40
codegen_flags: <defaults>
</compile_context>

<pallas_src>
import functools

import numpy as np
import jax
import jax.numpy as jnp
from jax import lax
from jax.experimental import pallas as pl
from jax.experimental.pallas import tpu as pltpu

LANE = 128
SUBLANE = 8


def _ohnm_kernel(x_ref, t_ref, o_ref, *, neg_ratio):
    x = x_ref[...]          # (R, 128) f32 logits (padded slots: x = 0)
    t = t_ref[...]          # (R, 128) f32 targets (padded slots: t = -1 -> ignored)

    pos_mask = t > 0.0
    neg_mask = t == 0.0

    pos_num = jnp.sum(pos_mask.astype(jnp.int32))       # exact int32 counts
    neg_count = jnp.sum(neg_mask.astype(jnp.int32))
    # PyTorch: neg_num = int(pos_num * neg_ratio)  (truncation toward zero).
    neg_num = (pos_num.astype(jnp.float32) * neg_ratio).astype(jnp.int32)
    # TODO(synk): PyTorch raises if neg_num > #negatives (topk k too large); we
    # clamp instead and average over the elements actually selected.
    k = jnp.minimum(neg_num, neg_count)

    # Shared transcendental: s = log(1 + exp(-|x|)).
    #   BCE(x, y)   = max(x, 0) - x*y + s
    #   softplus(x) = max(x, 0) + s          (= BCE with label 0)
    s = jnp.log(1.0 + jnp.exp(-jnp.abs(x)))
    softplus = jnp.maximum(x, 0.0) + s
    bce = softplus - x * t
    pos_loss_sum = jnp.sum(jnp.where(pos_mask, bce, 0.0))

    # Order-preserving int32 key: b = bits(x); key = b ^ 0x7FFFFFFF if b < 0 else b.
    # Strictly monotone in x (with -0.0 just below +0.0 -- harmless, equal values
    # give identical losses).
    b = pltpu.bitcast(x, jnp.int32)
    key = jnp.where(b < 0, b ^ 0x7FFFFFFF, b)

    # Traced int32 bounds (derived from a tracer so no concrete-array constants
    # end up captured in the kernel jaxpr).
    zero_i = pos_num * 0
    lo0 = zero_i + (-(2 ** 31))
    hi0 = zero_i + (2 ** 31 - 1)

    # Binary search for the largest threshold T with count(neg & key >= T) >= k,
    # i.e. T = key of the k-th largest negative logit (when k >= 1).
    def bs_body(_, carry):
        lo, hi = carry
        # overflow-safe ceil((lo + hi) / 2)
        mid = (lo >> 1) + (hi >> 1) + ((lo | hi) & 1)
        cnt = jnp.sum((neg_mask & (key >= mid)).astype(jnp.int32))
        take = cnt >= k
        return jnp.where(take, mid, lo), jnp.where(take, hi, mid - 1)

    tau, _ = lax.fori_loop(0, 34, bs_body, (lo0, hi0))

    gt_mask = neg_mask & (key > tau)
    eq_mask = neg_mask & (key == tau)
    count_gt = jnp.sum(gt_mask.astype(jnp.int32))
    count_eq = jnp.sum(eq_mask.astype(jnp.int32))
    sum_gt = jnp.sum(jnp.where(gt_mask, softplus, 0.0))
    sum_eq = jnp.sum(jnp.where(eq_mask, softplus, 0.0))

    # Everything strictly above the threshold is selected; of the ties at the
    # threshold, (k - count_gt) are selected -- all with identical loss values,
    # so use their mean (== the threshold element's softplus) times the count.
    rem = (k - count_gt).astype(jnp.float32)
    eq_contrib = jnp.where(
        count_eq > 0,
        sum_eq * rem / jnp.maximum(count_eq, 1).astype(jnp.float32),
        0.0,
    )
    neg_loss_sum = sum_gt + eq_contrib

    # NOTE: pos_num == 0 yields 0/0 = NaN, matching PyTorch's mean over an empty
    # selection.
    denom = (pos_num + k).astype(jnp.float32)
    loss = (pos_loss_sum + neg_loss_sum) / denom
    o_ref[...] = jnp.full((1, 1), loss, dtype=jnp.float32)


def ohnm_loss(logits, target, neg_ratio=3.0):
    x = logits.reshape(-1).astype(jnp.float32)
    t = target.reshape(-1).astype(jnp.float32)
    n = x.shape[0]
    blk = SUBLANE * LANE
    n_pad = ((n + blk - 1) // blk) * blk
    pad = n_pad - n
    x = jnp.pad(x, (0, pad))
    t = jnp.pad(t, (0, pad), constant_values=-1.0)   # padded slots are ignored
    rows = n_pad // LANE
    x2 = x.reshape(rows, LANE)
    t2 = t.reshape(rows, LANE)

    kernel = functools.partial(_ohnm_kernel, neg_ratio=float(neg_ratio))
    out = pl.pallas_call(
        kernel,
        out_shape=jax.ShapeDtypeStruct((1, 1), jnp.float32),
        grid=(1,),
        in_specs=[
            pl.BlockSpec((rows, LANE), lambda i: (0, 0)),
            pl.BlockSpec((rows, LANE), lambda i: (0, 0)),
        ],
        out_specs=pl.BlockSpec((1, 1), lambda i: (0, 0)),
        compiler_params=pltpu.CompilerParams(dimension_semantics=("arbitrary",)),
    )(x2, t2)
    return out[0, 0]


def _ref_ohnm(x, t, neg_ratio=3.0):
    """NumPy reference mirroring the PyTorch forward."""
    x = np.asarray(x, np.float64).reshape(-1)
    t = np.asarray(t, np.float64).reshape(-1)
    pos_logits = x[t > 0]
    pos_labels = t[t > 0]
    neg_logits = x[t == 0]
    pos_num = pos_logits.size
    neg_num = int(pos_num * neg_ratio)
    neg_top = np.sort(neg_logits)[::-1][:neg_num]
    logits = np.concatenate([pos_logits, neg_top])
    labels = np.concatenate([pos_labels, np.zeros(neg_top.size)])
    l = np.maximum(logits, 0) - logits * labels + np.log1p(np.exp(-np.abs(logits)))
    return l.mean()


if __name__ == "__main__":
    key = jax.random.PRNGKey(0)
    k1, k2 = jax.random.split(key)
    B, C, H, W = 2, 1, 16, 16           # small siamfc-style response map
    logits = jax.random.normal(k1, (B, C, H, W), dtype=jnp.float32)
    r = jax.random.randint(k2, (B, C, H, W), 0, 10)
    # ~10% positives (1), ~70% negatives (0), ~20% ignored (-1)
    target = jnp.where(r == 0, 1.0, jnp.where(r < 8, 0.0, -1.0)).astype(jnp.float32)
    # make sure there is at least one positive regardless of the random draw
    target = target.at[0, 0, 0, 0].set(1.0)

    loss = ohnm_loss(logits, target, neg_ratio=3.0)
    loss = jax.block_until_ready(loss)

    ref = _ref_ohnm(np.asarray(logits), np.asarray(target), 3.0)
    assert abs(float(loss) - float(ref)) < 1e-4, (float(loss), float(ref))
    print("KERNEL_OK")
</pallas_src>

<mosaic_0001>
module attributes {stable_mosaic.version = 11 : i64} {
  func.func @_ohnm_kernel(%arg0: i32, %arg1: memref<8x128xf32, #tpu.memory_space<vmem>>, %arg2: memref<8x128xf32, #tpu.memory_space<vmem>>, %arg3: memref<1x1xf32, #tpu.memory_space<vmem>>) attributes {dimension_semantics = [#tpu.dimension_semantics<arbitrary>], iteration_bounds = array<i64: 1>, scalar_prefetch = 0 : i64, scratch_operands = 0 : i64, tpu.core_type = #tpu.core_type<tc>, window_params = [{pipeline_mode = #tpu.pipeline_mode<synchronous>, transform_indices = @transform_0, window_bounds = array<i64: 8, 128>}, {pipeline_mode = #tpu.pipeline_mode<synchronous>, transform_indices = @transform_1, window_bounds = array<i64: 8, 128>}, {pipeline_mode = #tpu.pipeline_mode<synchronous>, transform_indices = @transform_2, window_bounds = array<i64: 1, 1>}]} {
    %c0 = arith.constant 0 : index
    %c0_0 = arith.constant 0 : index
    %0 = vector.load %arg1[%c0, %c0_0] : memref<8x128xf32, #tpu.memory_space<vmem>>, vector<8x128xf32>
    %c0_1 = arith.constant 0 : index
    %c0_2 = arith.constant 0 : index
    %1 = vector.load %arg2[%c0_1, %c0_2] : memref<8x128xf32, #tpu.memory_space<vmem>>, vector<8x128xf32>
    %cst = arith.constant 0.000000e+00 : f32
    %2 = vector.broadcast %cst : f32 to vector<8x128xf32>
    %3 = arith.cmpf ogt, %1, %2 : vector<8x128xf32>
    %cst_3 = arith.constant 0.000000e+00 : f32
    %4 = vector.broadcast %cst_3 : f32 to vector<8x128xf32>
    %5 = arith.cmpf oeq, %1, %4 : vector<8x128xf32>
    %6 = arith.extui %3 : vector<8x128xi1> to vector<8x128xi32>
    %7 = vector.shape_cast %6 : vector<8x128xi32> to vector<1x8x128xi32>
    %cst_4 = arith.constant dense<0> : vector<1xi32>
    %8 = vector.multi_reduction <add>, %7, %cst_4 [1, 2] : vector<1x8x128xi32> to vector<1xi32>
    %9 = vector.shape_cast %8 : vector<1xi32> to vector<1x1x1xi32>
    %10 = vector.extract %9[0, 0, 0] : i32 from vector<1x1x1xi32>
    %11 = arith.extui %5 : vector<8x128xi1> to vector<8x128xi32>
    %12 = vector.shape_cast %11 : vector<8x128xi32> to vector<1x8x128xi32>
    %cst_5 = arith.constant dense<0> : vector<1xi32>
    %13 = vector.multi_reduction <add>, %12, %cst_5 [1, 2] : vector<1x8x128xi32> to vector<1xi32>
    %14 = vector.shape_cast %13 : vector<1xi32> to vector<1x1x1xi32>
    %15 = vector.extract %14[0, 0, 0] : i32 from vector<1x1x1xi32>
    %16 = arith.sitofp %10 : i32 to f32
    %cst_6 = arith.constant 3.000000e+00 : f32
    %17 = arith.mulf %16, %cst_6 : f32
    %18 = arith.fptosi %17 : f32 to i32
    %19 = arith.minsi %18, %15 : i32
    %20 = math.absf %0 : vector<8x128xf32>
    %cst_7 = arith.constant 0.000000e+00 : f32
    %21 = vector.broadcast %cst_7 : f32 to vector<8x128xf32>
    %22 = arith.subf %21, %20 : vector<8x128xf32>
    %23 = math.exp %22 : vector<8x128xf32>
    %cst_8 = arith.constant 1.000000e+00 : f32
    %24 = vector.broadcast %cst_8 : f32 to vector<8x128xf32>
    %25 = arith.addf %24, %23 : vector<8x128xf32>
    %26 = math.log %25 : vector<8x128xf32>
    %cst_9 = arith.constant 0.000000e+00 : f32
    %27 = vector.broadcast %cst_9 : f32 to vector<8x128xf32>
    %28 = arith.maximumf %0, %27 : vector<8x128xf32>
    %29 = arith.addf %28, %26 : vector<8x128xf32>
    %30 = arith.mulf %0, %1 : vector<8x128xf32>
    %31 = arith.subf %29, %30 : vector<8x128xf32>
    %cst_10 = arith.constant 0.000000e+00 : f32
    %32 = vector.broadcast %cst_10 : f32 to vector<8x128xf32>
    %33 = arith.select %3, %31, %32 : vector<8x128xi1>, vector<8x128xf32>
    %34 = vector.shape_cast %33 : vector<8x128xf32> to vector<1x8x128xf32>
    %cst_11 = arith.constant dense<0.000000e+00> : vector<1xf32>
    %35 = vector.multi_reduction <add>, %34, %cst_11 [1, 2] : vector<1x8x128xf32> to vector<1xf32>
    %36 = vector.shape_cast %35 : vector<1xf32> to vector<1x1x1xf32>
    %37 = vector.extract %36[0, 0, 0] : f32 from vector<1x1x1xf32>
    %38 = tpu.bitcast %0 : vector<8x128xf32> -> vector<8x128xi32>
    %c0_i32 = arith.constant 0 : i32
    %39 = vector.broadcast %c0_i32 : i32 to vector<8x128xi32>
    %40 = arith.cmpi slt, %38, %39 : vector<8x128xi32>
    %c2147483647_i32 = arith.constant 2147483647 : i32
    %41 = vector.broadcast %c2147483647_i32 : i32 to vector<8x128xi32>
    %42 = arith.xori %38, %41 : vector<8x128xi32>
    %43 = arith.select %40, %42, %38 : vector<8x128xi1>, vector<8x128xi32>
    %c0_i32_12 = arith.constant 0 : i32
    %44 = arith.muli %10, %c0_i32_12 : i32
    %c-2147483648_i32 = arith.constant -2147483648 : i32
    %45 = arith.addi %44, %c-2147483648_i32 : i32
    %c2147483647_i32_13 = arith.constant 2147483647 : i32
    %46 = arith.addi %44, %c2147483647_i32_13 : i32
    %c0_i32_14 = arith.constant 0 : i32
    %c34_i32 = arith.constant 34 : i32
    %47 = arith.addi %c0_i32_14, %c34_i32 : i32
    %c1_i32 = arith.constant 1 : i32
    %48:2 = scf.for %arg4 = %c0_i32_14 to %47 step %c1_i32 iter_args(%arg5 = %45, %arg6 = %46) -> (i32, i32)  : i32 {
      %c1_i32_26 = arith.constant 1 : i32
      %92 = arith.shrsi %arg5, %c1_i32_26 : i32
      %c1_i32_27 = arith.constant 1 : i32
      %93 = arith.shrsi %arg6, %c1_i32_27 : i32
      %94 = arith.addi %92, %93 : i32
      %95 = arith.ori %arg5, %arg6 : i32
      %c1_i32_28 = arith.constant 1 : i32
      %96 = arith.andi %95, %c1_i32_28 : i32
      %97 = arith.addi %94, %96 : i32
      %98 = vector.broadcast %97 : i32 to vector<8x128xi32>
      %99 = arith.cmpi sge, %43, %98 : vector<8x128xi32>
      %100 = arith.andi %5, %99 : vector<8x128xi1>
      %101 = arith.extui %100 : vector<8x128xi1> to vector<8x128xi32>
      %102 = vector.shape_cast %101 : vector<8x128xi32> to vector<1x8x128xi32>
      %cst_29 = arith.constant dense<0> : vector<1xi32>
      %103 = vector.multi_reduction <add>, %102, %cst_29 [1, 2] : vector<1x8x128xi32> to vector<1xi32>
      %104 = vector.shape_cast %103 : vector<1xi32> to vector<1x1x1xi32>
      %105 = vector.extract %104[0, 0, 0] : i32 from vector<1x1x1xi32>
      %106 = arith.cmpi sge, %105, %19 : i32
      %107 = arith.select %106, %97, %arg5 : i32
      %c1_i32_30 = arith.constant 1 : i32
      %108 = arith.subi %97, %c1_i32_30 : i32
      %109 = arith.select %106, %arg6, %108 : i32
      scf.yield %107, %109 : i32, i32
    }
    %49 = vector.broadcast %48#0 : i32 to vector<8x128xi32>
    %50 = arith.cmpi sgt, %43, %49 : vector<8x128xi32>
    %51 = arith.andi %5, %50 : vector<8x128xi1>
    %52 = vector.broadcast %48#0 : i32 to vector<8x128xi32>
    %53 = arith.cmpi eq, %43, %52 : vector<8x128xi32>
    %54 = arith.andi %5, %53 : vector<8x128xi1>
    %55 = arith.extui %51 : vector<8x128xi1> to vector<8x128xi32>
    %56 = vector.shape_cast %55 : vector<8x128xi32> to vector<1x8x128xi32>
    %cst_15 = arith.constant dense<0> : vector<1xi32>
    %57 = vector.multi_reduction <add>, %56, %cst_15 [1, 2] : vector<1x8x128xi32> to vector<1xi32>
    %58 = vector.shape_cast %57 : vector<1xi32> to vector<1x1x1xi32>
    %59 = vector.extract %58[0, 0, 0] : i32 from vector<1x1x1xi32>
    %60 = arith.extui %54 : vector<8x128xi1> to vector<8x128xi32>
    %61 = vector.shape_cast %60 : vector<8x128xi32> to vector<1x8x128xi32>
    %cst_16 = arith.constant dense<0> : vector<1xi32>
    %62 = vector.multi_reduction <add>, %61, %cst_16 [1, 2] : vector<1x8x128xi32> to vector<1xi32>
    %63 = vector.shape_cast %62 : vector<1xi32> to vector<1x1x1xi32>
    %64 = vector.extract %63[0, 0, 0] : i32 from vector<1x1x1xi32>
    %cst_17 = arith.constant 0.000000e+00 : f32
    %65 = vector.broadcast %cst_17 : f32 to vector<8x128xf32>
    %66 = arith.select %51, %29, %65 : vector<8x128xi1>, vector<8x128xf32>
    %67 = vector.shape_cast %66 : vector<8x128xf32> to vector<1x8x128xf32>
    %cst_18 = arith.constant dense<0.000000e+00> : vector<1xf32>
    %68 = vector.multi_reduction <add>, %67, %cst_18 [1, 2] : vector<1x8x128xf32> to vector<1xf32>
    %69 = vector.shape_cast %68 : vector<1xf32> to vector<1x1x1xf32>
    %70 = vector.extract %69[0, 0, 0] : f32 from vector<1x1x1xf32>
    %cst_19 = arith.constant 0.000000e+00 : f32
    %71 = vector.broadcast %cst_19 : f32 to vector<8x128xf32>
    %72 = arith.select %54, %29, %71 : vector<8x128xi1>, vector<8x128xf32>
    %73 = vector.shape_cast %72 : vector<8x128xf32> to vector<1x8x128xf32>
    %cst_20 = arith.constant dense<0.000000e+00> : vector<1xf32>
    %74 = vector.multi_reduction <add>, %73, %cst_20 [1, 2] : vector<1x8x128xf32> to vector<1xf32>
    %75 = vector.shape_cast %74 : vector<1xf32> to vector<1x1x1xf32>
    %76 = vector.extract %75[0, 0, 0] : f32 from vector<1x1x1xf32>
    %77 = arith.subi %19, %59 : i32
    %78 = arith.sitofp %77 : i32 to f32
    %c0_i32_21 = arith.constant 0 : i32
    %79 = arith.cmpi sgt, %64, %c0_i32_21 : i32
    %80 = arith.mulf %76, %78 : f32
    %c1_i32_22 = arith.constant 1 : i32
    %81 = arith.maxsi %64, %c1_i32_22 : i32
    %82 = arith.sitofp %81 : i32 to f32
    %83 = arith.divf %80, %82 : f32
    %cst_23 = arith.constant 0.000000e+00 : f32
    %84 = arith.select %79, %83, %cst_23 : f32
    %85 = arith.addf %70, %84 : f32
    %86 = arith.addi %10, %19 : i32
    %87 = arith.sitofp %86 : i32 to f32
    %88 = arith.addf %37, %85 : f32
    %89 = arith.divf %88, %87 : f32
    %90 = vector.broadcast %89 : f32 to vector<1x1xf32>
    %c0_24 = arith.constant 0 : index
    %c0_25 = arith.constant 0 : index
    %91 = vector.load %arg3[%c0_24, %c0_25] : memref<1x1xf32, #tpu.memory_space<vmem>>, vector<1x1xf32>
    tpu.vector_store %arg3[%c0_24, %c0_25], %90 {strides = array<i32>} : memref<1x1xf32, #tpu.memory_space<vmem>>, vector<1x1xf32>,
    return
  }
  func.func @transform_0(%arg0: i32) -> (i32, i32) {
    %c0_i32 = arith.constant 0 : i32
    %c0_i32_0 = arith.constant 0 : i32
    %c0_i32_1 = arith.constant 0 : i32
    return %c0_i32, %c0_i32_0 : i32, i32
  }
  func.func @transform_1(%arg0: i32) -> (i32, i32) {
    %c0_i32 = arith.constant 0 : i32
    %c0_i32_0 = arith.constant 0 : i32
    %c0_i32_1 = arith.constant 0 : i32
    return %c0_i32, %c0_i32_0 : i32, i32
  }
  func.func @transform_2(%arg0: i32) -> (i32, i32) {
    %c0_i32 = arith.constant 0 : i32
    %c0_i32_0 = arith.constant 0 : i32
    %c0_i32_1 = arith.constant 0 : i32
    return %c0_i32, %c0_i32_0 : i32, i32
  }
}

</mosaic_0001>

<bundles_post_ra>
// kernel: tpu_custom_call.1
= control target key start
LH: loop header
LB: loop body
LE: loop exit
PB: predicated region body
PF: predicated region fallthrough
CT: control target
= control target key end

     0   :  { %7 = vsyncpa [#allocation3], 0  ;;  %s573_s0 = inlined_call_operand.hbm [shape: f32[8,128], index: 0, kind: input, shape index: {}]   ;;  %s574_s1 = inlined_call_operand.hbm [shape: f32[8,128], index: 1, kind: input, shape index: {}]   ;;  %s575_s2 = inlined_call_operand.hbm [shape: f32[1,1], index: 2, kind: output, shape index: {}]  }
   0x1   :  { %8 = vsyncpa [#allocation6], 0 }
   0x2   :  { %9 = vsyncpa [#allocation4], 0  ;;  %s425_s9 = smov [#allocation2]   ;;  %s426_s11 = smov [#allocation5]  }
   0x3   :  { %s16_s10 = sshll.u32 %s425_s9, 4  ;;  %s26_s12 = sshll.u32 %s426_s11, 4  ;;  %s17_s10 = int_to_ptr.vmem [resolvable:$true] %s16_s10  ;;  %s27_s12 = int_to_ptr.vmem [resolvable:$true] %s26_s12 }
   0x4   :  { %s329_s15 = scalar_lea.hbm %s573_s0, 128 }
   0x5   :  { %p330_p0 = scmp.ne.s32.totalorder %s573_s0, %s329_s15  ;;  %p333_p1 = scmp.lt.u32.totalorder %s329_s15, %s573_s0 }
   0x7   :  { %p335_p2 = pnand %p333_p1, %p330_p0 }
   0x9   :  { %338 = shalt.err (!%p335_p2)
}
   0xa   :  { %s339_s20 = scalar_lea.vmem %s17_s10, 128  ;;  %p344_p4 = scmp.lt.s32.totalorder %s17_s10, %s17_s10 }
   0xb   :  { %p340_p3 = scmp.ne.s32.totalorder %s17_s10, %s339_s20  ;;  %p345_p5 = scmp.lt.s32.totalorder %s339_s20, %s339_s20 }
   0xd   :  { %p346_p6 = por %p345_p5, %p344_p4 }
   0xf   :  { %p347_p7 = pnand %p346_p6, %p340_p3 }
  0x11   :  { %350 = shalt.err (!%p347_p7)
}
  0x12   :  { %19 = dma.hbm_to_vmem [thread:$0]  %s573_s0, 128, %s17_s10, [#allocation3]  }
  0x13   :  { %s351_s25 = scalar_lea.hbm %s574_s1, 128 }
  0x14   :  { %p352_p8 = scmp.ne.s32.totalorder %s574_s1, %s351_s25  ;;  %p355_p9 = scmp.lt.u32.totalorder %s351_s25, %s574_s1 }
  0x16   :  { %p357_p10 = pnand %p355_p9, %p352_p8 }
  0x18   :  { %360 = shalt.err (!%p357_p10)
}
  0x19   :  { %s361_s30 = scalar_lea.vmem %s27_s12, 128  ;;  %p366_p12 = scmp.lt.s32.totalorder %s27_s12, %s27_s12 }
  0x1a   :  { %p362_p11 = scmp.ne.s32.totalorder %s27_s12, %s361_s30  ;;  %p367_p13 = scmp.lt.s32.totalorder %s361_s30, %s361_s30 }
  0x1c   :  { %p368_p0 = por %p367_p13, %p366_p12 }
  0x1e   :  { %p369_p1 = pnand %p368_p0, %p362_p11 }
  0x20   :  { %372 = shalt.err (!%p369_p1)
}
  0x21   :  { %29 = dma.hbm_to_vmem [thread:$0]  %s574_s1, 128, %s27_s12, [#allocation6]  }
  0x22   :  { %407 = dma.done.wait [#allocation3], 128  }
  0x23   :  { %408 = vsyncadd [#allocation3], 4294967168 }
  0x24   :  { %409 = dma.done.wait [#allocation6], 128  }
  0x25   :  { %410 = vsyncadd [#allocation6], 4294967168  ;;  %v36_v0 = vld [vmem:[#allocation2] sm:$0xff]  ;;  %v469_v1 = vld [vmem:[#allocation5] sm:$0xff]  ;;  %v427_v3 = vmov 0   ;;  %s496_s12 = smov 2147483648  }
  0x26   :  { %vm107_vm0 = vcmp.lt.s32.totalorder %v36_v0, 0  ;;  %v108_v2 = vxor.u32 2147483647, %v36_v0  ;;  %vm38_vm1 = vcmp.gt.f32.partialorder %v469_v1, 0.0  ;;  %vm39_vm2 = vcmp.eq.f32.partialorder %v469_v1, 0.0  ;;  %s498_s13 = smov 0  }
  0x27   :  { %v40_v4 = vsel %vm38_vm1, 1, %v427_v3  ;;  %v60_v5 = vsel %vm39_vm2, 1, %v427_v3  ;;  %v85_v6 = vand.u32 2147483647, %v36_v0  ;;  %v92_v20 = vmax.f32 %v36_v0, 0.0 }
  0x28   :  { %v479_v7 = vsel %vm107_vm0, %v108_v2, %v36_v0  ;;  %v42_v8 = vshrl.u32 %v40_v4, 16  ;;  %v41_v9 = vand.u32 65535, %v40_v4  ;;  %v62_v10 = vshrl.u32 %v60_v5, 16  ;;  %s494_s11 = smov 2147483647  }
  0x29   :  { %v61_v11 = vand.u32 65535, %v60_v5  ;;  %v86_v12 = vsub.f32 0.0, %v85_v6  ;;  %v94_v23 = vmul.f32 %v469_v1, %v36_v0 }
  0x2a   :  { %v44_v13 = vcvt.s32.f32 %v42_v8  ;;  %v64_v14 = vcvt.s32.f32 %v62_v10  ;;  %v43_v16 = vcvt.s32.f32 %v41_v9 }
  0x2b   :  { %v87_v15 = vmul.f32 1.442695, %v86_v12  ;;  %v63_v17 = vcvt.s32.f32 %v61_v11 }
  0x2c   :  { %47 = vadd.xlane.f32.xlu0 %v44_v13  ;;  %67 = vadd.xlane.f32.xlu1 %v64_v14 }
  0x2d   :  { %321 = vpow2.f32 %v87_v15 }
  0x30   :  { %45 = vadd.xlane.f32.xlu0 %v43_v16  ;;  %65 = vadd.xlane.f32.xlu1 %v63_v17 }
  0x37   :  { %v322_v18 = vpop.eup %321 }
  0x38   :  { %v89_v19 = vadd.f32 1.0, %v322_v18 }
  0x3a   :  { %323 = vlog2.f32 %v89_v19 }
  0x44   :  { %v324_v21 = vpop.eup %323 }
  0x45   :  { %v91_v22 = vmul.f32 0.6931472, %v324_v21 }
  0x47   :  { %v482_v24 = vadd.f32 %v92_v20, %v91_v22 }
  0x49   :  { %v95_v25 = vsub.f32 %v482_v24, %v94_v23 }
  0x4b   :  { %v96_v26 = vsel %vm38_vm1, %v95_v25, 0.0 }
  0x4c   :  { %97 = vadd.xlane.f32.xlu0 %v96_v26 }
  0xb9   :  { %v48_v27 = vpop.xlane.xlu0 %47  ;;  %v68_v28 = vpop.xlane.xlu1 %67 }
  0xba   :  { %v50_v29 = vcvt.f32.s32 %v48_v27  ;;  %v70_v30 = vcvt.f32.s32 %v68_v28 }
  0xbc   :  { %v51_v31 = vshll.u32 %v50_v29, 16  ;;  %v71_v32 = vshll.u32 %v70_v30, 16 }
  0xbd   :  { %v46_v33 = vpop.xlane.xlu0 %45  ;;  %v66_v34 = vpop.xlane.xlu1 %65 }
  0xbe   :  { %v49_v35 = vcvt.f32.s32 %v46_v33  ;;  %v69_v36 = vcvt.f32.s32 %v66_v34 }
  0xc0   :  { %v52_v37 = vadd.s32 %v51_v31, %v49_v35  ;;  %v72_v38 = vadd.s32 %v71_v32, %v69_v36 }
  0xc2   :  { %v53_v39 = vrot.slane %v52_v37, 4  ;;  %v73_v40 = vrot.slane %v72_v38, 4 }
  0xc4   :  { %v74_v41 = vadd.s32 %v73_v40, %v72_v38  ;;  %v54_v42 = vadd.s32 %v53_v39, %v52_v37 }
  0xc6   :  { %v55_v43 = vrot.slane %v54_v42, 2  ;;  %v75_v44 = vrot.slane %v74_v41, 2 }
  0xc8   :  { %v56_v45 = vadd.s32 %v55_v43, %v54_v42  ;;  %v76_v46 = vadd.s32 %v75_v44, %v74_v41 }
  0xca   :  { %v57_v47 = vrot.slane %v56_v45, 1  ;;  %v77_v48 = vrot.slane %v76_v46, 1 }
  0xcc   :  { %v58_v49 = vadd.s32 %v57_v47, %v56_v45  ;;  %v78_v50 = vadd.s32 %v77_v48, %v76_v46 }
  0xce   :  { %267 = vpush %v58_v49 }
  0xcf   :  { %269 = vpush %v78_v50 }
  0xd9   :  { %v98_v51 = vpop.xlane.xlu0 %97 }
  0xda   :  { %v99_v52 = vrot.slane %v98_v51, 4 }
  0xdc   :  { %v100_v53 = vadd.f32 %v99_v52, %v98_v51 }
  0xde   :  { %v101_v54 = vrot.slane %v100_v53, 2 }
  0xe0   :  { %v102_v55 = vadd.f32 %v101_v54, %v100_v53 }
  0xe2   :  { %v103_v56 = vrot.slane %v102_v55, 1 }
  0xe4   :  { %v104_v57 = vadd.f32 %v103_v56, %v102_v55 }
  0xe6   :  { %276 = vpush %v104_v57 }
  0xff   :  { %s487_s1 = spop %267 }
 0x100   :  { %s80_s4 = scvt.s32.f32 %s487_s1  ;;  %s270_s8 = spop %269 }
 0x102   :  { %s81_s5 = smul.f32 3.0, %s80_s4 }
 0x104   :  { %p271_p2 = scmp.lt.s32.totalorder %s81_s5, 0  ;;  %s272_s6 = sceil.f32 %s81_s5 }
 0x105   :  { %s273_s7 = sfloor.f32 %s81_s5 }
 0x106   :  { %s582_s6 = smov (!%p271_p2, %s272_s6), %s273_s7 }
 0x107   :  { %s275_s9 = scvt.f32.s32 %s582_s6 }
 0x109   :  { %p83_p3 = scmp.lt.s32.totalorder %s275_s9, %s270_s8 }
 0x10b   :  { %s584_s9 = smov (!%p83_p3, %s275_s9), %s270_s8 }
 0x117   :  { %s492_s10 = spop %276 }
 0x118 LB: > { %s118_s14 = sshra.s32 %s419_s12, 1  ;;  %s119_s15 = sshra.s32 %s415_s11, 1  ;;  %v428_v59 = vmov 0   ;;  %s423_s13 = sphi %s498_s13, %s115_s13   ;;  %s419_s12 = sphi %s496_s12, %s576_s12   ;;  %s415_s11 = sphi %s494_s11, %s588_s11  }
 0x119   : > { %s120_s16 = sadd.s32 %s119_s15, %s118_s14  ;;  %s121_s17 = sor.u32 %s415_s11, %s419_s12 }
 0x11a   : > { %s122_s18 = sand.u32 1, %s121_s17  ;;  %s115_s13 = sadd.s32 1, %s423_s13  }
 0x11b   : > { %s513_s19 = sadd.s32 %s122_s18, %s120_s16  ;;  %p112_p5 = scmp.ge.s32.totalorder %s115_s13, 34  }
 0x11c   : > { %v124_v58 = vstv %s513_s19  ;;  %s266_s21 = sadd.s32 4294967295, %s513_s19  ;;  %s229_s22 = sadd.s32 (%p112_p5), %s487_s1, %s584_s9  ;;  %vm237_vm9 = vcmask (%p112_p5), 0  }
 0x11d   : > { %vm125_vm3 = vcmp.ge.s32.totalorder %v479_v7, %v124_v58  ;;  %s230_s25 = scvt.s32.f32 (%p112_p5), %s229_s22  ;;  %s429_s8 = smov (%p112_p5), [#allocation7]  }
 0x11e   : > { %vm126_vm4 = vmand %vm39_vm2, %vm125_vm3 }
 0x11f   : > { %v127_v60 = vsel %vm126_vm4, 1, %v428_v59 }
 0x120   : > { %v129_v61 = vshrl.u32 %v127_v60, 16  ;;  %v128_v62 = vand.u32 65535, %v127_v60 }
 0x122   : > { %v131_v63 = vcvt.s32.f32 %v129_v61  ;;  %v130_v0 = vcvt.s32.f32 %v128_v62 }
 0x124   : > { %134 = vadd.xlane.f32.xlu0 %v131_v63 }
 0x128   : > { %132 = vadd.xlane.f32.xlu0 %v130_v0 }
 0x1b1   : > { %v135_v2 = vpop.xlane.xlu0 %134 }
 0x1b2   : > { %v137_v4 = vcvt.f32.s32 %v135_v2 }
 0x1b4   : > { %v138_v6 = vshll.u32 %v137_v4, 16  ;;  %v232_v4 = vstv (%p112_p5), %s230_s25 }
 0x1b5   : > { %v133_v5 = vpop.xlane.xlu0 %132  ;;  %325 = vrcp.f32 (%p112_p5), %v232_v4 }
 0x1b6   : > { %v136_v8 = vcvt.f32.s32 %v133_v5 }
 0x1b8   : > { %v139_v9 = vadd.s32 %v138_v6, %v136_v8 }
 0x1ba   : > { %v140_v10 = vrot.slane %v139_v9, 4 }
 0x1bc   : > { %v141_v11 = vadd.s32 %v140_v10, %v139_v9 }
 0x1be   : > { %v142_v12 = vrot.slane %v141_v11, 2 }
 0x1bf   :  { %v326_v6 = vpop.eup (%p112_p5), %325 }
 0x1c0   : > { %v143_v13 = vadd.s32 %v142_v12, %v141_v11 }
 0x1c2   : > { %v144_v14 = vrot.slane %v143_v13, 1 }
 0x1c4   : > { %v145_v15 = vadd.s32 %v144_v14, %v143_v13 }
 0x1c6   : > { %278 = vpush %v145_v15 }
 0x1f5   :  { %114 = sbr.rel (!%p112_p5) target bundleno = 280 (0x118), region = 43 }
 0x1f7   : > { %s279_s20 = spop %278 }
 0x1f8   : > { %p147_p4 = scmp.ge.s32.totalorder %s279_s20, %s584_s9 }
 0x1fa   : > { %s586_s19 = smov (!%p147_p4, %s513_s19), %s419_s12  ;;  %s588_s11 = smov (!%p147_p4, %s415_s11), %s266_s21 }
 0x1fb   : > { %s576_s12 = smov %s586_s19  ;;  %v151_v16 = vstv (%p112_p5), %s586_s19  ;;  %s245_s11 = sshll.u32 (%p112_p5), %s429_s8, 4  ;;  %s246_s11 = int_to_ptr.vmem [resolvable:$true] %s245_s11 }
 0x1fc   :  { %vm152_vm5 = vcmp.gt.s32.totalorder %v479_v7, %v151_v16  ;;  %vm154_vm6 = vcmp.eq.s32.totalorder %v479_v7, %v151_v16  ;;  %s373_s13 = scalar_lea.vmem %s246_s11, 16  ;;  %p378_p9 = scmp.lt.s32.totalorder %s246_s11, %s246_s11 }
 0x1fd   :  { %vm535_vm7 = vmand %vm39_vm2, %vm152_vm5  ;;  %p374_p8 = scmp.ne.s32.totalorder %s246_s11, %s373_s13 }
 0x1fe   :  { %v156_v18 = vsel %vm535_vm7, 1, %v427_v3  ;;  %vm544_vm8 = vmand %vm39_vm2, %vm154_vm6  ;;  %v196_v1 = vsel %vm535_vm7, %v482_v24, 0.0 }
 0x1ff   :  { %v158_v20 = vshrl.u32 %v156_v18, 16  ;;  %v157_v21 = vand.u32 65535, %v156_v18  ;;  %v176_v7 = vsel %vm544_vm8, 1, %v427_v3  ;;  %v206_v29 = vsel %vm544_vm8, %v482_v24, 0.0 }
 0x200   :  { %v178_v22 = vshrl.u32 %v176_v7, 16  ;;  %v177_v23 = vand.u32 65535, %v176_v7 }
 0x201   :  { %v160_v25 = vcvt.s32.f32 %v158_v20  ;;  %v159_v26 = vcvt.s32.f32 %v157_v21 }
 0x202   :  { %v180_v27 = vcvt.s32.f32 %v178_v22  ;;  %v179_v28 = vcvt.s32.f32 %v177_v23 }
 0x203   :  { %163 = vadd.xlane.f32.xlu0 %v160_v25  ;;  %161 = vadd.xlane.f32.xlu1 %v159_v26 }
 0x207   :  { %183 = vadd.xlane.f32.xlu0 %v180_v27  ;;  %181 = vadd.xlane.f32.xlu1 %v179_v28 }
 0x20b   :  { %197 = vadd.xlane.f32.xlu0 %v196_v1  ;;  %207 = vadd.xlane.f32.xlu1 %v206_v29 }
 0x290   :  { %v164_v3 = vpop.xlane.xlu0 %163  ;;  %v162_v30 = vpop.xlane.xlu1 %161 }
 0x291   :  { %v166_v31 = vcvt.f32.s32 %v164_v3  ;;  %v165_v32 = vcvt.f32.s32 %v162_v30 }
 0x293   :  { %v167_v33 = vshll.u32 %v166_v31, 16 }
 0x294   :  { %v184_v34 = vpop.xlane.xlu0 %183  ;;  %v182_v35 = vpop.xlane.xlu1 %181 }
 0x295   :  { %v168_v36 = vadd.s32 %v167_v33, %v165_v32  ;;  %v186_v37 = vcvt.f32.s32 %v184_v34  ;;  %v185_v38 = vcvt.f32.s32 %v182_v35 }
 0x297   :  { %v169_v39 = vrot.slane %v168_v36, 4  ;;  %v187_v40 = vshll.u32 %v186_v37, 16 }
 0x298   :  { %v198_v41 = vpop.xlane.xlu0 %197  ;;  %v208_v42 = vpop.xlane.xlu1 %207 }
 0x299   :  { %v188_v43 = vadd.s32 %v187_v40, %v185_v38  ;;  %v199_v44 = vrot.slane %v198_v41, 4  ;;  %v209_v45 = vrot.slane %v208_v42, 4  ;;  %v170_v24 = vadd.s32 %v169_v39, %v168_v36 }
 0x29b   :  { %v189_v46 = vrot.slane %v188_v43, 4  ;;  %v200_v47 = vadd.f32 %v199_v44, %v198_v41  ;;  %v210_v48 = vadd.f32 %v209_v45, %v208_v42  ;;  %v171_v49 = vrot.slane %v170_v24, 2 }
 0x29d   :  { %v190_v50 = vadd.s32 %v189_v46, %v188_v43  ;;  %v201_v51 = vrot.slane %v200_v47, 2  ;;  %v211_v52 = vrot.slane %v210_v48, 2  ;;  %v172_v53 = vadd.s32 %v171_v49, %v170_v24 }
 0x29f   :  { %v202_v54 = vadd.f32 %v201_v51, %v200_v47  ;;  %v212_v55 = vadd.f32 %v211_v52, %v210_v48  ;;  %v173_v56 = vrot.slane %v172_v53, 1  ;;  %v191_v57 = vrot.slane %v190_v50, 2 }
 0x2a1   :  { %v174_v58 = vadd.s32 %v173_v56, %v172_v53  ;;  %v192_v59 = vadd.s32 %v191_v57, %v190_v50  ;;  %v203_v60 = vrot.slane %v202_v54, 1  ;;  %v213_v61 = vrot.slane %v212_v55, 1 }
 0x2a3   :  { %280 = vpush %v174_v58  ;;  %v193_v62 = vrot.slane %v192_v59, 1  ;;  %v204_v63 = vadd.f32 %v203_v60, %v202_v54  ;;  %v214_v2 = vadd.f32 %v213_v61, %v212_v55 }
 0x2a5   :  { %v194_v0 = vadd.s32 %v193_v62, %v192_v59 }
 0x2a7   :  { %282 = vpush %v194_v0 }
 0x2a8   :  { %284 = vpush %v204_v63 }
 0x2a9   :  { %286 = vpush %v214_v2 }
 0x2d4   :  { %s281_s23 = spop %280 }
 0x2d5   :  { %s216_s28 = ssub.s32 %s584_s9, %s281_s23  ;;  %s377_s9 = scalar_lea.vmem %s246_s11, 32 }
 0x2d6   :  { %s217_s30 = scvt.s32.f32 %s216_s28  ;;  %p379_p10 = scmp.lt.s32.totalorder %s377_s9, %s373_s13 }
 0x2d8   :  { %s283_s24 = spop %282  ;;  %p380_p11 = por %p379_p10, %p378_p9 }
 0x2d9   :  { %p220_p6 = scmp.gt.s32.totalorder %s283_s24, 1  ;;  %s285_s29 = spop %284 }
 0x2da   :  { %s287_s0 = spop %286  ;;  %p218_p7 = scmp.gt.s32.totalorder %s283_s24, 0 }
 0x2db   :  { %s221_s26 = scalar_select %p220_p6, %s283_s24, 1 }
 0x2dc   :  { %s219_s3 = smul.f32 %s287_s0, %s217_s30  ;;  %p381_p12 = pnand %p380_p11, %p374_p8 }
 0x2dd   :  { %s222_s27 = scvt.s32.f32 %s221_s26 }
 0x2df   :  { %v223_v5 = vstv %s222_s27 }
 0x2e0   :  { %327 = vrcp.f32 %v223_v5 }
 0x2ea   :  { %v328_v8 = vpop.eup %327 }
 0x2eb   :  { %288 = vpush %v328_v8 }
 0x2ec   :  { %290 = vpush %v326_v6 }
 0x31c   :  { %s289_s1 = spop %288 }
 0x31d   :  { %s226_s4 = smul.f32 %s289_s1, %s219_s3  ;;  %s291_s6 = spop %290 }
 0x31f   :  { %s590_s4 = smov (!%p218_p7, %s226_s4), 0.0 }
 0x320   :  { %s228_s5 = sadd.f32 %s285_s29, %s590_s4 }
 0x322   :  { %s231_s7 = sadd.f32 %s492_s10, %s228_s5 }
 0x324   :  { %s235_s12 = smul.f32 %s291_s6, %s231_s7 }
 0x326   :  { %v236_v9 = vstv %s235_s12 }
 0x327   :  { %238 = vst.msk [vmem:[#allocation7] sm:$0x1] %vm237_vm9, %v236_v9 }
 0x328   :  { %384 = shalt.err (!%p381_p12)
}
 0x329   :  { %s385_s16 = scalar_lea.hbm %s575_s2, 16 }
 0x32a   :  { %p386_p13 = scmp.ne.s32.totalorder %s575_s2, %s385_s16  ;;  %p389_p0 = scmp.lt.u32.totalorder %s385_s16, %s575_s2 }
 0x32c   :  { %p391_p1 = pnand %p389_p0, %p386_p13 }
 0x32e   :  { %394 = shalt.err (!%p391_p1)
}
 0x32f   :  { %248 = dma.vmem_to_hbm [thread:$0]  %s246_s11, 16, %s575_s2, [#allocation4]  }
 0x330   :  { %411 = dma.done.wait [#allocation4], 16  }
 0x331   :  { %412 = vsyncadd [#allocation4], 4294967280 }
 0x332   :  { %252 = vsyncpa [#allocation3], 1 }
 0x333   :  { %253 = vsyncpa [#allocation6], 1 }
 0x334   :  { %254 = vsyncpa [#allocation4], 1 }

</bundles_post_ra>
